<compile_context>
chip_gen: v7x
topology: tpu7x:2x2x1
jax: 0.10.0
libtpu: 0.0.40
codegen_flags: <defaults>
</compile_context>

<pallas_src>
import jax
import jax.numpy as jnp
from jax.experimental import pallas as pl
from jax.experimental.pallas import tpu as pltpu


TN = 1024        # lane-dense last dim (multiple of 128) -> unmasked full-width vst
TM_MAX = 1024    # max sublane rows per tile: (1024, 1024) f32 = 4 MiB


def _scalar_fma_kernel(wb_ref, x_ref, o_ref):
    # wb_ref: SMEM (2,) f32 holding [w, b]; x_ref / o_ref: VMEM (tm, TN) lane-dense tiles.
    w = wb_ref[0]
    b = wb_ref[1]
    o_ref[...] = (x_ref[...] * w + b).astype(o_ref.dtype)


def linear_regression_forward(x, weight, bias):
    """x: (N, 1) float32; weight: (1, 1); bias: (1,). Returns (N, 1) = x @ W^T + b."""
    n = x.shape[0]
    flat = x.reshape(-1)                           # in_features == 1  ->  (N,)
    total = flat.shape[0]
    dtype = x.dtype

    # Sublane granularity gated on dtype: (8,128) f32, (16,128) bf16, (32,128) 8-bit.
    sub = max(8, 32 // jnp.dtype(dtype).itemsize)

    # Pad only to a sublane-aligned row granularity (<= sub*TN elements of waste, 32 KiB
    # for f32) -- never to a full tile -- and skip the pad when already aligned.
    row_pad = sub * TN
    padded = pl.cdiv(total, row_pad) * row_pad
    if padded != total:
        flat = jnp.pad(flat, (0, padded - total))
    rows = padded // TN
    x2d = flat.reshape(rows, TN)

    # Balanced row tiles of at most TM_MAX rows.  Force >= 2 tiles when there is enough
    # data (>= 2 sublane rows) so both v7x TensorCores receive work; Pallas masks the
    # ragged last block, so tm does not need to divide rows.
    n_blocks = pl.cdiv(rows, TM_MAX)
    if n_blocks == 1 and rows >= 2 * sub:
        n_blocks = 2
    tm = min(TM_MAX, pl.cdiv(rows, n_blocks))
    tm = pl.cdiv(tm, sub) * sub                    # keep sublane-aligned
    grid = (pl.cdiv(rows, tm),)

    # Pack w and b as two scalars for SMEM (keeps the (1,1) params out of VMEM vreg tiles).
    wb = jnp.concatenate([weight.reshape(-1), bias.reshape(-1)]).astype(jnp.float32)

    out2d = pl.pallas_call(
        _scalar_fma_kernel,
        out_shape=jax.ShapeDtypeStruct(x2d.shape, dtype),
        grid=grid,
        in_specs=[
            pl.BlockSpec(memory_space=pltpu.MemorySpace.SMEM),   # [w, b] scalars
            pl.BlockSpec((tm, TN), lambda i: (i, 0)),            # pipelined row tiles
        ],
        out_specs=pl.BlockSpec((tm, TN), lambda i: (i, 0)),
        compiler_params=pltpu.CompilerParams(
            dimension_semantics=("parallel",),        # shard row tiles across TCs on v7x
            vmem_limit_bytes=32 * 1024 * 1024,        # 4 MiB tiles, 2x-buffered in+out = 16 MiB
        ),
    )(wb, x2d)

    # Trim the padded tail (no-op copy when padded == total) and restore (N, 1).
    return out2d.reshape(-1)[:total].reshape(n, 1)


if __name__ == "__main__":
    key = jax.random.PRNGKey(0)
    kx, kw, kb, kx2, kx3 = jax.random.split(key, 5)

    # Deterministic parameter init (mimics nn.Linear(1, 1) shapes).
    weight = jax.random.uniform(kw, (1, 1), jnp.float32, minval=-1.0, maxval=1.0)
    bias = jax.random.uniform(kb, (1,), jnp.float32, minval=-1.0, maxval=1.0)

    # Small batch of scalar inputs: (8, 1) -> single tiny tile.
    x = jax.random.normal(kx, (8, 1), jnp.float32)
    y = jax.block_until_ready(linear_regression_forward(x, weight, bias))
    y_ref = x @ weight.T + bias
    assert y.shape == (8, 1)
    assert jnp.allclose(y, y_ref, atol=1e-5, rtol=1e-5)

    # Non-multiple-of-128 batch: exercises padding/trim.
    x2 = jax.random.normal(kx2, (3000, 1), jnp.float32)
    y2 = jax.block_until_ready(linear_regression_forward(x2, weight, bias))
    y2_ref = x2 @ weight.T + bias
    assert y2.shape == (3000, 1)
    assert jnp.allclose(y2, y2_ref, atol=1e-5, rtol=1e-5)

    # Larger batch: exercises the forced >=2-tile grid and a ragged (masked) last block.
    x3 = jax.random.normal(kx3, (20000, 1), jnp.float32)
    y3 = jax.block_until_ready(linear_regression_forward(x3, weight, bias))
    y3_ref = x3 @ weight.T + bias
    assert y3.shape == (20000, 1)
    assert jnp.allclose(y3, y3_ref, atol=1e-5, rtol=1e-5)

    print("KERNEL_OK")
</pallas_src>

<mosaic_0001>
module attributes {stable_mosaic.version = 11 : i64} {
  func.func @_scalar_fma_kernel(%arg0: i32, %arg1: memref<2xf32, #tpu.memory_space<smem>>, %arg2: memref<8x1024xf32, #tpu.memory_space<vmem>>, %arg3: memref<8x1024xf32, #tpu.memory_space<vmem>>) attributes {dimension_semantics = [#tpu.dimension_semantics<parallel>], iteration_bounds = array<i64: 1>, scalar_prefetch = 0 : i64, scratch_operands = 0 : i64, tpu.core_type = #tpu.core_type<tc>, window_params = [{transform_indices = @transform_0, window_bounds = array<i64: 2>}, {transform_indices = @transform_1, window_bounds = array<i64: 8, 1024>}, {transform_indices = @transform_2, window_bounds = array<i64: 8, 1024>}]} {
    %c0 = arith.constant 0 : index
    %0 = memref.load %arg1[%c0] : memref<2xf32, #tpu.memory_space<smem>>
    %c1 = arith.constant 1 : index
    %1 = memref.load %arg1[%c1] : memref<2xf32, #tpu.memory_space<smem>>
    %c0_0 = arith.constant 0 : index
    %c0_1 = arith.constant 0 : index
    %2 = vector.load %arg2[%c0_0, %c0_1] : memref<8x1024xf32, #tpu.memory_space<vmem>>, vector<8x1024xf32>
    %3 = vector.broadcast %0 : f32 to vector<8x1024xf32>
    %4 = arith.mulf %2, %3 : vector<8x1024xf32>
    %5 = vector.broadcast %1 : f32 to vector<8x1024xf32>
    %6 = arith.addf %4, %5 : vector<8x1024xf32>
    %c0_2 = arith.constant 0 : index
    %c0_3 = arith.constant 0 : index
    %7 = vector.load %arg3[%c0_2, %c0_3] : memref<8x1024xf32, #tpu.memory_space<vmem>>, vector<8x1024xf32>
    tpu.vector_store %arg3[%c0_2, %c0_3], %6 {strides = array<i32>} : memref<8x1024xf32, #tpu.memory_space<vmem>>, vector<8x1024xf32>,
    return
  }
  func.func @transform_0(%arg0: i32) -> i32 {
    %c0_i32 = arith.constant 0 : i32
    %c0_i32_0 = arith.constant 0 : i32
    return %c0_i32 : i32
  }
  func.func @transform_1(%arg0: i32) -> (i32, i32) {
    %c0_i32 = arith.constant 0 : i32
    %c0_i32_0 = arith.constant 0 : i32
    return %arg0, %c0_i32 : i32, i32
  }
  func.func @transform_2(%arg0: i32) -> (i32, i32) {
    %c0_i32 = arith.constant 0 : i32
    %c0_i32_0 = arith.constant 0 : i32
    return %arg0, %c0_i32 : i32, i32
  }
}

</mosaic_0001>

<bundles_post_ra>
// kernel: tpu_custom_call.1
= control target key start
LH: loop header
LB: loop body
LE: loop exit
PB: predicated region body
PF: predicated region fallthrough
CT: control target
= control target key end

     0   :  { %7 = vsyncpa [#allocation5], 0  ;;  %s205_s0 = inlined_call_operand.hbm [shape: f32[2], index: 0, kind: input, shape index: {}]   ;;  %s206_s1 = inlined_call_operand.hbm [shape: f32[8,1024], index: 1, kind: input, shape index: {}]   ;;  %s207_s2 = inlined_call_operand.hbm [shape: f32[8,1024], index: 2, kind: output, shape index: {}]  }
   0x1   :  { %8 = vsyncpa [#allocation3], 0 }
   0x2   :  { %9 = vsyncpa [#allocation4], 0  ;;  %s91_s11 = scalar_lea.hbm %s205_s0, 16 }
   0x3   :  { %p92_p0 = scmp.ne.s32.totalorder %s205_s0, %s91_s11  ;;  %p95_p1 = scmp.lt.u32.totalorder %s91_s11, %s205_s0 }
   0x5   :  { %p97_p2 = pnand %p95_p1, %p92_p0 }
   0x7   :  { %100 = shalt.err (!%p97_p2)
}
   0x8   :  { %s151_s16 = smov [#allocation2]   ;;  %s152_s19 = smov [#allocation6]  }
   0x9   :  { %17 = dma.hbm_to_smem %s205_s0, 16, %s151_s16, [#allocation5]  }
   0xa   :  { %s24_s20 = sshll.u32 %s152_s19, 4  ;;  %s101_s23 = scalar_lea.hbm %s206_s1, 1024  ;;  %s25_s20 = int_to_ptr.vmem [resolvable:$true] %s24_s20 }
   0xb   :  { %p102_p3 = scmp.ne.s32.totalorder %s206_s1, %s101_s23  ;;  %p105_p4 = scmp.lt.u32.totalorder %s101_s23, %s206_s1 }
   0xd   :  { %p107_p5 = pnand %p105_p4, %p102_p3 }
   0xf   :  { %110 = shalt.err (!%p107_p5)
}
  0x10   :  { %s111_s28 = scalar_lea.vmem %s25_s20, 1024  ;;  %p116_p7 = scmp.lt.s32.totalorder %s25_s20, %s25_s20 }
  0x11   :  { %p112_p6 = scmp.ne.s32.totalorder %s25_s20, %s111_s28  ;;  %p117_p8 = scmp.lt.s32.totalorder %s111_s28, %s111_s28 }
  0x13   :  { %p118_p9 = por %p117_p8, %p116_p7 }
  0x15   :  { %p119_p10 = pnand %p118_p9, %p112_p6 }
  0x17   :  { %122 = shalt.err (!%p119_p10)
}
  0x18   :  { %27 = dma.hbm_to_vmem [thread:$0]  %s206_s1, 1024, %s25_s20, [#allocation3]  }
  0x19   :  { %145 = dma.done.wait [#allocation5], 16  }
  0x1a   :  { %146 = vsyncadd [#allocation5], 4294967280 }
  0x1b   :  { %147 = dma.done.wait [#allocation3], 1024  }
  0x1c   :  { %148 = vsyncadd [#allocation3], 4294966272 }
  0x1d   :  { %34 = sfence }
  0x1e   :  { %s35_s30 = sld [smem:[#allocation2]]  ;;  %s87_s3 = sld [smem:[#allocation2 + $0x1]]  ;;  %v37_v0 = vld [vmem:[#allocation6] sm:$0xff]  ;;  %v38_v1 = vld [vmem:[#allocation6 + $0x8] sm:$0xff]  ;;  %v39_v2 = vld [vmem:[#allocation6 + $0x10] sm:$0xff] }
  0x1f   :  { %v40_v3 = vld [vmem:[#allocation6 + $0x18] sm:$0xff]  ;;  %v41_v4 = vld [vmem:[#allocation6 + $0x20] sm:$0xff]  ;;  %v42_v5 = vld [vmem:[#allocation6 + $0x28] sm:$0xff]  ;;  %s153_s1 = smov [#allocation7]  }
  0x20   :  { %v43_v6 = vld [vmem:[#allocation6 + $0x30] sm:$0xff]  ;;  %v44_v7 = vld [vmem:[#allocation6 + $0x38] sm:$0xff]  ;;  %s77_s4 = sshll.u32 %s153_s1, 4  ;;  %s78_s4 = int_to_ptr.vmem [resolvable:$true] %s77_s4 }
  0x21   :  { %s123_s5 = scalar_lea.vmem %s78_s4, 1024  ;;  %p128_p12 = scmp.lt.s32.totalorder %s78_s4, %s78_s4 }
  0x22   :  { %p124_p11 = scmp.ne.s32.totalorder %s78_s4, %s123_s5  ;;  %p129_p13 = scmp.lt.s32.totalorder %s123_s5, %s123_s5 }
  0x24   :  { %v45_v8 = vstv %s35_s30  ;;  %v54_v9 = vstv %s87_s3  ;;  %p130_p0 = por %p129_p13, %p128_p12 }
  0x25   :  { %v46_v10 = vmul.f32 %v45_v8, %v37_v0  ;;  %v47_v11 = vmul.f32 %v45_v8, %v38_v1  ;;  %v48_v12 = vmul.f32 %v45_v8, %v39_v2  ;;  %v49_v13 = vmul.f32 %v45_v8, %v40_v3 }
  0x26   :  { %v50_v14 = vmul.f32 %v45_v8, %v41_v4  ;;  %v51_v15 = vmul.f32 %v45_v8, %v42_v5  ;;  %v52_v16 = vmul.f32 %v45_v8, %v43_v6  ;;  %v53_v17 = vmul.f32 %v45_v8, %v44_v7  ;;  %p131_p1 = pnand %p130_p0, %p124_p11 }
  0x27   :  { %v55_v18 = vadd.f32 %v54_v9, %v46_v10  ;;  %v56_v19 = vadd.f32 %v54_v9, %v47_v11  ;;  %v57_v20 = vadd.f32 %v54_v9, %v48_v12  ;;  %v58_v21 = vadd.f32 %v54_v9, %v49_v13 }
  0x28   :  { %v59_v22 = vadd.f32 %v54_v9, %v50_v14  ;;  %v60_v23 = vadd.f32 %v54_v9, %v51_v15  ;;  %v61_v24 = vadd.f32 %v54_v9, %v52_v16  ;;  %v62_v25 = vadd.f32 %v54_v9, %v53_v17 }
  0x29   :  { %63 = vst [vmem:[#allocation7] sm:$0xff] %v55_v18  ;;  %64 = vst [vmem:[#allocation7 + $0x8] sm:$0xff] %v56_v19 }
  0x2a   :  { %65 = vst [vmem:[#allocation7 + $0x10] sm:$0xff] %v57_v20  ;;  %66 = vst [vmem:[#allocation7 + $0x18] sm:$0xff] %v58_v21 }
  0x2b   :  { %67 = vst [vmem:[#allocation7 + $0x20] sm:$0xff] %v59_v22  ;;  %68 = vst [vmem:[#allocation7 + $0x28] sm:$0xff] %v60_v23 }
  0x2c   :  { %69 = vst [vmem:[#allocation7 + $0x30] sm:$0xff] %v61_v24  ;;  %70 = vst [vmem:[#allocation7 + $0x38] sm:$0xff] %v62_v25 }
  0x2d   :  { %134 = shalt.err (!%p131_p1)
}
  0x2e   :  { %s135_s8 = scalar_lea.hbm %s207_s2, 1024 }
  0x2f   :  { %p136_p2 = scmp.ne.s32.totalorder %s207_s2, %s135_s8  ;;  %p139_p3 = scmp.lt.u32.totalorder %s135_s8, %s207_s2 }
  0x31   :  { %p141_p4 = pnand %p139_p3, %p136_p2 }
  0x33   :  { %144 = shalt.err (!%p141_p4)
}
  0x34   :  { %80 = dma.vmem_to_hbm [thread:$0]  %s78_s4, 1024, %s207_s2, [#allocation4]  }
  0x35   :  { %149 = dma.done.wait [#allocation4], 1024  }
  0x36   :  { %150 = vsyncadd [#allocation4], 4294966272 }
  0x37   :  { %84 = vsyncpa [#allocation3], 1 }
  0x38   :  { %85 = vsyncpa [#allocation4], 1 }
  0x39   :  { %86 = vsyncpa [#allocation5], 1 }

</bundles_post_ra>
